<compile_context>
chip_gen: v5e
topology: v5e:2x2
jax: 0.10.0
libtpu: 0.0.40
codegen_flags: <defaults>
</compile_context>

<pallas_src>
import math

import numpy as np
import jax
import jax.numpy as jnp
from jax import lax
from jax.experimental import pallas as pl
from jax.experimental.pallas import tpu as pltpu

MODE_NAMES = ("v1ancdisv1", "v1ancdisv2", "v2ancdisv1", "v2ancdisv2")


# ----------------------------------------------------------------------------
# Host-side glue: port of the string-parsing loop.
# TODO(synk): indmat string parsing has no Pallas equivalent; it only yields
#             static integer tables / 0-1 masks, so nothing numeric is lost.
# ----------------------------------------------------------------------------
def build_index_tables(indmat):
    N = indmat.shape[0]
    K = N // 2
    C = 1 + (N - 2) // 2
    rows = {m: np.zeros((K,), np.int32) for m in MODE_NAMES}
    cols = {m: np.zeros((K, C), np.int32) for m in MODE_NAMES}
    for i in range(N):
        anc_ind = i + 1 if i % 2 == 0 else i - 1
        indrow = [s.split("_") for s in list(indmat[i, :])]
        anc = [indrow[anc_ind][0], indrow[anc_ind][1]]
        same = [j for j, s in enumerate(indrow) if s[3] == anc[1] and s[0] != s[2]]
        diff = [j for j, s in enumerate(indrow) if s[3] != anc[1] and s[0] != s[2]]
        p = i // 2
        if i % 2 == 0:
            targets = (("v1ancdisv1", same), ("v1ancdisv2", diff))
        else:
            targets = (("v2ancdisv2", same), ("v2ancdisv1", diff))
        for name, neg_idx in targets:
            rows[name][p] = i
            cols[name][p, 0] = anc_ind
            cols[name][p, 1:] = np.asarray(neg_idx, np.int32)
    return rows, cols


def build_selection_masks(indmat, modes, oneanchorperk):
    """Static 0/1 masks over the flattened anchor pair [row 2p | row 2p+1] (len 2N)."""
    indmat = np.asarray(indmat)
    N = indmat.shape[0]
    K = N // 2
    Kr = 1 if oneanchorperk else K
    rows, cols = build_index_tables(indmat)
    M = len(modes)
    neg_w = np.zeros((M, Kr, 2 * N), np.float32)
    anc_w = np.zeros((M, Kr, 2 * N), np.float32)
    for mi, m in enumerate(modes):
        for p in range(Kr):
            r = int(rows[m][p])
            half = r - 2 * p                      # 0 (view-1 row) or 1 (view-2 row)
            anc_w[mi, p, half * N + int(cols[m][p, 0])] = 1.0
            for j in cols[m][p, 1:]:
                neg_w[mi, p, half * N + int(j)] = 1.0
    return neg_w, anc_w


# ----------------------------------------------------------------------------
# Tiling helpers (generation-aware)
# ----------------------------------------------------------------------------
def _vmem_capacity_bytes():
    try:
        info = pltpu.get_tpu_info()
        cap = int(getattr(info, "vmem_capacity_bytes", 0) or 0)
        if cap > 0:
            return cap
    except Exception:
        pass
    return 64 * 1024 * 1024     # safe default: v7x has 64 MiB per TensorCore


def _lcm(a, b):
    return a * b // math.gcd(a, b)


def _pick_row_tile(total_rows, lane, kr, planes, vmem_bytes, requested=None):
    # Row tile must be a multiple of lcm(8, Kr): 8 for sublane alignment,
    # Kr so the host-tiled resident masks line up with a constant index_map.
    unit = _lcm(8, max(kr, 1))
    if requested is not None:
        return max(unit, ((int(requested) + unit - 1) // unit) * unit)
    lane_pad = ((lane + 127) // 128) * 128
    bytes_per_row = 4 * lane_pad
    # Conservative budget: mat double-buffered + (bias + weight planes), all
    # assumed double-buffered even if Buffered(1) lands on the resident inputs.
    factor = 2 + 2 * (1 + planes)
    budget = max(vmem_bytes // 3, 2 * 1024 * 1024)
    max_rows = max(unit, (budget // (bytes_per_row * factor)) // unit * unit)
    needed = ((total_rows + unit - 1) // unit) * unit
    r = min(max_rows, needed)
    # Prefer >= 2 grid blocks when there is enough work: the "parallel" grid
    # axis only uses the second v7x TensorCore if num_blocks >= 2.
    if total_rows >= 2 * unit:
        while r > unit and -(-total_rows // r) < 2:
            r -= unit
    return r


# ----------------------------------------------------------------------------
# Pallas kernels: bias-add, stabilized exp, folded-mask reductions, -log,
# tail-row masking and a lane-dense per-block partial-sum tile.
# ----------------------------------------------------------------------------
def _make_kernel_allden(row_tile, total_rows):
    def kernel(mat_ref, bias_ref, wanc_ref, wneg_ref, out_ref):
        xb = mat_ref[...] + bias_ref[...]                   # (R, L); unused cols ~ -1e30
        c = jnp.max(xb, axis=1, keepdims=True)              # per-row masked max
        e = jnp.exp(xb - c)                                  # unused cols -> 0
        anc = jnp.sum(e * wanc_ref[...], axis=1, keepdims=True)   # (1/M)*sum_m exp(anc_m - c)
        neg = jnp.sum(e * wneg_ref[...], axis=1, keepdims=True)   # sum of all negatives
        # NOTE: the reference clamps its L1 denominator at 1e-12; with the shift
        # by c the shifted denominator is >= exp(0) = 1 for finite inputs, so no
        # clamp is required (only degenerate +-inf/NaN inputs would differ).
        contrib = jnp.log(anc + neg) - jnp.log(anc)          # shift c cancels exactly
        r0 = pl.program_id(0) * row_tile
        ridx = r0 + lax.broadcasted_iota(jnp.int32, (row_tile, 1), 0)
        contrib = jnp.where(ridx < total_rows, contrib, 0.0)
        out_ref[...] = jnp.zeros((1, 8, 128), jnp.float32) + jnp.sum(contrib)
    return kernel


def _make_kernel_permode(num_modes, row_tile, total_rows):
    nm = np.float32(num_modes)

    def kernel(mat_ref, bias_ref, wden_ref, wancsum_ref, out_ref):
        xb = mat_ref[...] + bias_ref[...]                    # (R, L)
        c = jnp.max(xb, axis=1, keepdims=True)
        e = jnp.exp(xb - c)
        # sum_m raw_anchor_m = sum_lane(xb * sum_m onehot_m) - M*c
        # (each one-hot sums to exactly 1 per row; bias is 0 at anchor columns)
        contrib = nm * c - jnp.sum(xb * wancsum_ref[...], axis=1, keepdims=True)
        for m in range(num_modes):                           # static unroll (M <= 4)
            den = jnp.sum(e * wden_ref[m], axis=1, keepdims=True)
            contrib = contrib + jnp.log(den)                 # log(den_m) - raw_m summed
        r0 = pl.program_id(0) * row_tile
        ridx = r0 + lax.broadcasted_iota(jnp.int32, (row_tile, 1), 0)
        contrib = jnp.where(ridx < total_rows, contrib, 0.0)
        out_ref[...] = jnp.zeros((1, 8, 128), jnp.float32) + jnp.sum(contrib)
    return kernel


_RESIDENT_OK = [True]    # whether pipeline_mode=pl.Buffered(1) lowers on this jax/TPU


def contrastive_loss_pallas(mat, indmat, modes, allden, oneanchorperk,
                            row_tile=None):
    # note: the module's `all_loss` attribute is unused in its forward pass.
    indmat = np.asarray(indmat)
    mat = jnp.asarray(mat, jnp.float32)
    B, N, _ = mat.shape
    K = N // 2
    Kr = 1 if oneanchorperk else K
    L = 2 * N
    M = len(modes)

    neg_w, anc_w = build_selection_masks(indmat, modes, oneanchorperk)  # (M,Kr,L)
    used = (neg_w.sum(axis=0) + anc_w.sum(axis=0)) > 0.0                # (Kr,L)
    # -1e30 sentinel: unused columns never win the masked max and exp to 0.
    bias_kr = np.where(used, np.float32(0.0), np.float32(-1e30)).astype(np.float32)

    total_rows = B * Kr
    planes = 2 if allden else (M + 1)
    vmem_total = _vmem_capacity_bytes()
    rt = _pick_row_tile(total_rows, L, Kr, planes, vmem_total, row_tile)
    num_blocks = -(-total_rows // rt)
    rows_padded = num_blocks * rt
    reps = rt // Kr

    # oneanchorperk touches only anchor pair 0 (rows 0,1): slice before the
    # kernel so HBM traffic / exp count shrink by K.  The (B,2Kr,N)->(B*Kr,2N)
    # reshape is contiguous (free); tail rows are zero-padded and masked.
    mat2d = mat[:, : 2 * Kr, :].reshape(B * Kr, L)
    if rows_padded != total_rows:
        mat2d = jnp.pad(mat2d, ((0, rows_padded - total_rows), (0, 0)))

    bias = jnp.asarray(np.tile(bias_kr, (reps, 1)))                      # (rt, L)
    if allden:
        wanc = jnp.asarray(np.tile(anc_w.sum(axis=0) / np.float32(M),
                                   (reps, 1)).astype(np.float32))        # (rt, L)
        wneg = jnp.asarray(np.tile(neg_w.sum(axis=0),
                                   (reps, 1)).astype(np.float32))        # (rt, L)
        weights = (bias, wanc, wneg)
        kernel = _make_kernel_allden(rt, total_rows)
    else:
        wden = jnp.asarray(np.tile(anc_w + neg_w,
                                   (1, reps, 1)).astype(np.float32))     # (M, rt, L)
        wancsum = jnp.asarray(np.tile(anc_w.sum(axis=0),
                                      (reps, 1)).astype(np.float32))     # (rt, L)
        weights = (bias, wden, wancsum)
        kernel = _make_kernel_permode(M, rt, total_rows)

    # Generation-aware VMEM ceiling: ~96 MiB on v5e/v6e (128 MiB physical),
    # ~48 MiB on v7x (64 MiB physical).
    vmem_limit = int(min(max(vmem_total * 3 // 4, 32 * 1024 * 1024),
                         112 * 1024 * 1024))

    def _resident_spec(arr, use_hint):
        nd = arr.ndim
        imap = (lambda i: (0, 0)) if nd == 2 else (lambda i: (0, 0, 0))
        if use_hint:
            # Resident blocks (constant index_map): no double-buffering needed.
            return pl.BlockSpec(arr.shape, imap, pipeline_mode=pl.Buffered(1))
        return pl.BlockSpec(arr.shape, imap)

    def _launch(use_hint):
        in_specs = [pl.BlockSpec((rt, L), lambda i: (i, 0))]
        in_specs += [_resident_spec(w, use_hint) for w in weights]
        return pl.pallas_call(
            kernel,
            out_shape=jax.ShapeDtypeStruct((num_blocks, 8, 128), jnp.float32),
            grid=(num_blocks,),
            in_specs=in_specs,
            out_specs=pl.BlockSpec((1, 8, 128), lambda i: (i, 0, 0)),
            compiler_params=pltpu.CompilerParams(
                dimension_semantics=("parallel",),   # shard row blocks across cores
                vmem_limit_bytes=vmem_limit,
            ),
        )(mat2d, *weights)

    if _RESIDENT_OK[0]:
        try:
            partials = _launch(True)
        except Exception:
            _RESIDENT_OK[0] = False
            partials = _launch(False)
    else:
        partials = _launch(False)

    # mean(dim=2), mean(dim=1), sum(dim=0)  ==  total_sum / (B * Kr)
    scale = np.float32(1.0 / (B * Kr))
    return jnp.sum(partials[:, 0, 0]) * scale


# ----------------------------------------------------------------------------
# Independent numpy reference: line-by-line port of the PyTorch forward.
# ----------------------------------------------------------------------------
def torch_style_reference(mat_np, indmat, modes, allden, oneanchorperk):
    B, N, _ = mat_np.shape
    K = N // 2
    C = 1 + (N - 2) // 2
    ancs = {m: np.full((B, K, 1), -99.0, np.float32) for m in MODE_NAMES}
    negs = {m: np.full((B, K, C - 1), -99.0, np.float32) for m in MODE_NAMES}
    for i in range(N):
        anc_ind = i + 1 if i % 2 == 0 else i - 1
        temprow = mat_np[:, i, :]
        indrow = [s.split("_") for s in list(indmat[i, :])]
        anc = [indrow[anc_ind][0], indrow[anc_ind][1]]
        same_l = [s for s in indrow if s[3] == anc[1]]
        diff_l = [s for s in indrow if s[3] != anc[1]]
        same_l = [s for s in same_l if s[0] != s[2]]
        diff_l = [s for s in diff_l if s[0] != s[2]]
        same_ind = [j for j, e in enumerate(indrow) if e in same_l]
        diff_ind = [j for j, e in enumerate(indrow) if e in diff_l]
        num = temprow[:, anc_ind][:, None]
        p = i // 2
        if i % 2 == 0:
            ancs["v1ancdisv1"][:, p, :] = num
            ancs["v1ancdisv2"][:, p, :] = num
            negs["v1ancdisv1"][:, p, :] = temprow[:, same_ind]
            negs["v1ancdisv2"][:, p, :] = temprow[:, diff_ind]
        else:
            ancs["v2ancdisv2"][:, p, :] = num
            ancs["v2ancdisv1"][:, p, :] = num
            negs["v2ancdisv2"][:, p, :] = temprow[:, same_ind]
            negs["v2ancdisv1"][:, p, :] = temprow[:, diff_ind]
    allmodes = {m: np.concatenate([ancs[m], negs[m]], axis=2)[None] for m in MODE_NAMES}
    loss_set = np.stack([allmodes[m][0] for m in modes], axis=0)     # (M,B,K,C)
    loss_set = np.exp(loss_set)
    if allden:
        red = loss_set.sum(axis=0, keepdims=True)
        red[:, :, :, 0] = red[:, :, :, 0] / len(modes)
    else:
        red = loss_set
    if oneanchorperk:
        red = red[:, :, 0:1, :]
    denom = np.maximum(np.abs(red).sum(axis=3, keepdims=True), 1e-12)
    out = red / denom
    cal = out[:, :, :, 0]
    step = -np.log(cal)
    return step.mean(axis=2).mean(axis=1).sum(axis=0)


if __name__ == "__main__":
    def make_indmat(num_vids):
        n = 2 * num_vids
        vids = [p for p in range(num_vids) for _ in range(2)]
        views = ["a", "b"] * num_vids
        return np.array(
            [[f"{vids[i]}_{views[i]}_{vids[j]}_{views[j]}" for j in range(n)]
             for i in range(n)])

    key = jax.random.PRNGKey(0)
    cases = [
        # (batch, num_video_pairs, explicit row_tile)
        (2, 4, None),    # tiny: single block, tail-padded oneanchorperk rows
        (6, 3, None),    # Kr=3 -> row unit 24, non-divisible rows (tail masked)
        (16, 4, 16),     # multi-block grid (4 blocks when Kr=4)
    ]
    configs = [
        (list(MODE_NAMES), True, False),
        (list(MODE_NAMES), False, False),
        (list(MODE_NAMES), True, True),
        (["v1ancdisv2", "v2ancdisv1"], False, True),
    ]
    for B, nv, rt in cases:
        N = 2 * nv
        indmat = make_indmat(nv)
        key, sub = jax.random.split(key)
        mat = jax.random.normal(sub, (B, N, N), dtype=jnp.float32) * 0.5
        mat_np = np.asarray(mat)
        for modes, allden, oneanchorperk in configs:
            got = contrastive_loss_pallas(mat, indmat, modes, allden,
                                          oneanchorperk, row_tile=rt)
            got = jax.block_until_ready(got)
            want = torch_style_reference(mat_np, indmat, modes, allden, oneanchorperk)
            np.testing.assert_allclose(np.asarray(got), want, rtol=1e-3, atol=1e-4)

    print("KERNEL_OK")
</pallas_src>

<mosaic_0001>
module attributes {stable_mosaic.version = 11 : i64} {
  func.func @kernel(%arg0: i32, %arg1: memref<8x16xf32, #tpu.memory_space<vmem>>, %arg2: memref<8x16xf32, #tpu.memory_space<vmem>>, %arg3: memref<8x16xf32, #tpu.memory_space<vmem>>, %arg4: memref<8x16xf32, #tpu.memory_space<vmem>>, %arg5: memref<1x8x128xf32, #tpu.memory_space<vmem>>) attributes {dimension_semantics = [#tpu.dimension_semantics<parallel>], iteration_bounds = array<i64: 1>, scalar_prefetch = 0 : i64, scratch_operands = 0 : i64, tpu.core_type = #tpu.core_type<tc>, window_params = [{transform_indices = @transform_0, window_bounds = array<i64: 8, 16>}, {pipeline_mode = #tpu.pipeline_mode<synchronous>, transform_indices = @transform_1, window_bounds = array<i64: 8, 16>}, {pipeline_mode = #tpu.pipeline_mode<synchronous>, transform_indices = @transform_2, window_bounds = array<i64: 8, 16>}, {pipeline_mode = #tpu.pipeline_mode<synchronous>, transform_indices = @transform_3, window_bounds = array<i64: 8, 16>}, {transform_indices = @transform_4, window_bounds = array<i64: 1, 8, 128>}]} {
    %c0 = arith.constant 0 : index
    %c0_0 = arith.constant 0 : index
    %0 = vector.load %arg1[%c0, %c0_0] : memref<8x16xf32, #tpu.memory_space<vmem>>, vector<8x16xf32>
    %c0_1 = arith.constant 0 : index
    %c0_2 = arith.constant 0 : index
    %1 = vector.load %arg2[%c0_1, %c0_2] : memref<8x16xf32, #tpu.memory_space<vmem>>, vector<8x16xf32>
    %2 = arith.addf %0, %1 : vector<8x16xf32>
    %cst = arith.constant dense<0xFF800000> : vector<8xf32>
    %3 = vector.multi_reduction <maximumf>, %2, %cst [1] : vector<8x16xf32> to vector<8xf32>
    %4 = vector.shape_cast %3 : vector<8xf32> to vector<8x1xf32>
    %5 = vector.broadcast %4 : vector<8x1xf32> to vector<8x16xf32>
    %6 = arith.subf %2, %5 : vector<8x16xf32>
    %7 = math.exp %6 : vector<8x16xf32>
    %c0_3 = arith.constant 0 : index
    %c0_4 = arith.constant 0 : index
    %8 = vector.load %arg3[%c0_3, %c0_4] : memref<8x16xf32, #tpu.memory_space<vmem>>, vector<8x16xf32>
    %9 = arith.mulf %7, %8 : vector<8x16xf32>
    %cst_5 = arith.constant dense<0.000000e+00> : vector<8xf32>
    %10 = vector.multi_reduction <add>, %9, %cst_5 [1] : vector<8x16xf32> to vector<8xf32>
    %11 = vector.shape_cast %10 : vector<8xf32> to vector<8x1xf32>
    %c0_6 = arith.constant 0 : index
    %c0_7 = arith.constant 0 : index
    %12 = vector.load %arg4[%c0_6, %c0_7] : memref<8x16xf32, #tpu.memory_space<vmem>>, vector<8x16xf32>
    %13 = arith.mulf %7, %12 : vector<8x16xf32>
    %cst_8 = arith.constant dense<0.000000e+00> : vector<8xf32>
    %14 = vector.multi_reduction <add>, %13, %cst_8 [1] : vector<8x16xf32> to vector<8xf32>
    %15 = vector.shape_cast %14 : vector<8xf32> to vector<8x1xf32>
    %16 = arith.addf %11, %15 : vector<8x1xf32>
    %17 = math.log %16 : vector<8x1xf32>
    %18 = math.log %11 : vector<8x1xf32>
    %19 = arith.subf %17, %18 : vector<8x1xf32>
    %c8_i32 = arith.constant 8 : i32
    %20 = arith.muli %arg0, %c8_i32 : i32
    %21 = tpu.iota {dimensions = array<i32: 0>} : vector<8x1xi32>
    %22 = vector.broadcast %20 : i32 to vector<8x1xi32>
    %23 = arith.addi %22, %21 : vector<8x1xi32>
    %c8_i32_9 = arith.constant 8 : i32
    %24 = vector.broadcast %c8_i32_9 : i32 to vector<8x1xi32>
    %25 = arith.cmpi slt, %23, %24 : vector<8x1xi32>
    %cst_10 = arith.constant 0.000000e+00 : f32
    %26 = vector.broadcast %cst_10 : f32 to vector<8x1xf32>
    %27 = arith.select %25, %19, %26 : vector<8x1xi1>, vector<8x1xf32>
    %cst_11 = arith.constant 0.000000e+00 : f32
    %28 = vector.broadcast %cst_11 : f32 to vector<1x8x128xf32>
    %29 = vector.shape_cast %27 : vector<8x1xf32> to vector<1x8x1xf32>
    %cst_12 = arith.constant dense<0.000000e+00> : vector<1xf32>
    %30 = vector.multi_reduction <add>, %29, %cst_12 [1, 2] : vector<1x8x1xf32> to vector<1xf32>
    %31 = vector.shape_cast %30 : vector<1xf32> to vector<1x1x1xf32>
    %32 = vector.extract %31[0, 0, 0] : f32 from vector<1x1x1xf32>
    %33 = vector.broadcast %32 : f32 to vector<1x8x128xf32>
    %34 = arith.addf %28, %33 : vector<1x8x128xf32>
    %c0_13 = arith.constant 0 : index
    %c0_14 = arith.constant 0 : index
    %c0_15 = arith.constant 0 : index
    %35 = vector.load %arg5[%c0_13, %c0_14, %c0_15] : memref<1x8x128xf32, #tpu.memory_space<vmem>>, vector<1x8x128xf32>
    tpu.vector_store %arg5[%c0_13, %c0_14, %c0_15], %34 {strides = array<i32>} : memref<1x8x128xf32, #tpu.memory_space<vmem>>, vector<1x8x128xf32>,
    return
  }
  func.func @transform_0(%arg0: i32) -> (i32, i32) {
    %c0_i32 = arith.constant 0 : i32
    %c0_i32_0 = arith.constant 0 : i32
    return %arg0, %c0_i32 : i32, i32
  }
  func.func @transform_1(%arg0: i32) -> (i32, i32) {
    %c0_i32 = arith.constant 0 : i32
    %c0_i32_0 = arith.constant 0 : i32
    %c0_i32_1 = arith.constant 0 : i32
    return %c0_i32, %c0_i32_0 : i32, i32
  }
  func.func @transform_2(%arg0: i32) -> (i32, i32) {
    %c0_i32 = arith.constant 0 : i32
    %c0_i32_0 = arith.constant 0 : i32
    %c0_i32_1 = arith.constant 0 : i32
    return %c0_i32, %c0_i32_0 : i32, i32
  }
  func.func @transform_3(%arg0: i32) -> (i32, i32) {
    %c0_i32 = arith.constant 0 : i32
    %c0_i32_0 = arith.constant 0 : i32
    %c0_i32_1 = arith.constant 0 : i32
    return %c0_i32, %c0_i32_0 : i32, i32
  }
  func.func @transform_4(%arg0: i32) -> (i32, i32, i32) {
    %c0_i32 = arith.constant 0 : i32
    %c0_i32_0 = arith.constant 0 : i32
    %c0_i32_1 = arith.constant 0 : i32
    return %arg0, %c0_i32, %c0_i32_0 : i32, i32, i32
  }
}

module attributes {stable_mosaic.version = 11 : i64} {
  func.func @kernel(%arg0: i32, %arg1: memref<8x16xf32, #tpu.memory_space<vmem>>, %arg2: memref<8x16xf32, #tpu.memory_space<vmem>>, %arg3: memref<8x16xf32, #tpu.memory_space<vmem>>, %arg4: memref<8x16xf32, #tpu.memory_space<vmem>>, %arg5: memref<1x8x128xf32, #tpu.memory_space<vmem>>) attributes {dimension_semantics = [#tpu.dimension_semantics<parallel>], iteration_bounds = array<i64: 1>, scalar_prefetch = 0 : i64, scratch_operands = 0 : i64, tpu.core_type = #tpu.core_type<tc>, window_params = [{transform_indices = @transform_0, window_bounds = array<i64: 8, 16>}, {pipeline_mode = #tpu.pipeline_mode<synchronous>, transform_indices = @transform_1, window_bounds = array<i64: 8, 16>}, {pipeline_mode = #tpu.pipeline_mode<synchronous>, transform_indices = @transform_2, window_bounds = array<i64: 8, 16>}, {pipeline_mode = #tpu.pipeline_mode<synchronous>, transform_indices = @transform_3, window_bounds = array<i64: 8, 16>}, {transform_indices = @transform_4, window_bounds = array<i64: 1, 8, 128>}]} {
    %c0 = arith.constant 0 : index
    %c0_0 = arith.constant 0 : index
    %0 = vector.load %arg1[%c0, %c0_0] : memref<8x16xf32, #tpu.memory_space<vmem>>, vector<8x16xf32>
    %c0_1 = arith.constant 0 : index
    %c0_2 = arith.constant 0 : index
    %1 = vector.load %arg2[%c0_1, %c0_2] : memref<8x16xf32, #tpu.memory_space<vmem>>, vector<8x16xf32>
    %2 = arith.addf %0, %1 : vector<8x16xf32>
    %cst = arith.constant dense<0xFF800000> : vector<8xf32>
    %3 = vector.multi_reduction <maximumf>, %2, %cst [1] : vector<8x16xf32> to vector<8xf32>
    %4 = vector.shape_cast %3 : vector<8xf32> to vector<8x1xf32>
    %5 = vector.broadcast %4 : vector<8x1xf32> to vector<8x16xf32>
    %6 = arith.subf %2, %5 : vector<8x16xf32>
    %7 = math.exp %6 : vector<8x16xf32>
    %c0_3 = arith.constant 0 : index
    %c0_4 = arith.constant 0 : index
    %8 = vector.load %arg3[%c0_3, %c0_4] : memref<8x16xf32, #tpu.memory_space<vmem>>, vector<8x16xf32>
    %9 = arith.mulf %7, %8 : vector<8x16xf32>
    %cst_5 = arith.constant dense<0.000000e+00> : vector<8xf32>
    %10 = vector.multi_reduction <add>, %9, %cst_5 [1] : vector<8x16xf32> to vector<8xf32>
    %11 = vector.shape_cast %10 : vector<8xf32> to vector<8x1xf32>
    %c0_6 = arith.constant 0 : index
    %c0_7 = arith.constant 0 : index
    %12 = vector.load %arg4[%c0_6, %c0_7] : memref<8x16xf32, #tpu.memory_space<vmem>>, vector<8x16xf32>
    %13 = arith.mulf %7, %12 : vector<8x16xf32>
    %cst_8 = arith.constant dense<0.000000e+00> : vector<8xf32>
    %14 = vector.multi_reduction <add>, %13, %cst_8 [1] : vector<8x16xf32> to vector<8xf32>
    %15 = vector.shape_cast %14 : vector<8xf32> to vector<8x1xf32>
    %16 = arith.addf %11, %15 : vector<8x1xf32>
    %17 = math.log %16 : vector<8x1xf32>
    %18 = math.log %11 : vector<8x1xf32>
    %19 = arith.subf %17, %18 : vector<8x1xf32>
    %c8_i32 = arith.constant 8 : i32
    %20 = arith.muli %arg0, %c8_i32 : i32
    %21 = tpu.iota {dimensions = array<i32: 0>} : vector<8x1xi32>
    %22 = vector.broadcast %20 : i32 to vector<8x1xi32>
    %23 = arith.addi %22, %21 : vector<8x1xi32>
    %c8_i32_9 = arith.constant 8 : i32
    %24 = vector.broadcast %c8_i32_9 : i32 to vector<8x1xi32>
    %25 = arith.cmpi slt, %23, %24 : vector<8x1xi32>
    %cst_10 = arith.constant 0.000000e+00 : f32
    %26 = vector.broadcast %cst_10 : f32 to vector<8x1xf32>
    %27 = arith.select %25, %19, %26 : vector<8x1xi1>, vector<8x1xf32>
    %cst_11 = arith.constant 0.000000e+00 : f32
    %28 = vector.broadcast %cst_11 : f32 to vector<1x8x128xf32>
    %29 = vector.shape_cast %27 : vector<8x1xf32> to vector<1x8x1xf32>
    %cst_12 = arith.constant dense<0.000000e+00> : vector<1xf32>
    %30 = vector.multi_reduction <add>, %29, %cst_12 [1, 2] : vector<1x8x1xf32> to vector<1xf32>
    %31 = vector.shape_cast %30 : vector<1xf32> to vector<1x1x1xf32>
    %32 = vector.extract %31[0, 0, 0] : f32 from vector<1x1x1xf32>
    %33 = vector.broadcast %32 : f32 to vector<1x8x128xf32>
    %34 = arith.addf %28, %33 : vector<1x8x128xf32>
    %c0_13 = arith.constant 0 : index
    %c0_14 = arith.constant 0 : index
    %c0_15 = arith.constant 0 : index
    %35 = vector.load %arg5[%c0_13, %c0_14, %c0_15] : memref<1x8x128xf32, #tpu.memory_space<vmem>>, vector<1x8x128xf32>
    tpu.vector_store %arg5[%c0_13, %c0_14, %c0_15], %34 {strides = array<i32>} : memref<1x8x128xf32, #tpu.memory_space<vmem>>, vector<1x8x128xf32>,
    return
  }
  func.func @transform_0(%arg0: i32) -> (i32, i32) {
    %c0_i32 = arith.constant 0 : i32
    %c0_i32_0 = arith.constant 0 : i32
    return %arg0, %c0_i32 : i32, i32
  }
  func.func @transform_1(%arg0: i32) -> (i32, i32) {
    %c0_i32 = arith.constant 0 : i32
    %c0_i32_0 = arith.constant 0 : i32
    %c0_i32_1 = arith.constant 0 : i32
    return %c0_i32, %c0_i32_0 : i32, i32
  }
  func.func @transform_2(%arg0: i32) -> (i32, i32) {
    %c0_i32 = arith.constant 0 : i32
    %c0_i32_0 = arith.constant 0 : i32
    %c0_i32_1 = arith.constant 0 : i32
    return %c0_i32, %c0_i32_0 : i32, i32
  }
  func.func @transform_3(%arg0: i32) -> (i32, i32) {
    %c0_i32 = arith.constant 0 : i32
    %c0_i32_0 = arith.constant 0 : i32
    %c0_i32_1 = arith.constant 0 : i32
    return %c0_i32, %c0_i32_0 : i32, i32
  }
  func.func @transform_4(%arg0: i32) -> (i32, i32, i32) {
    %c0_i32 = arith.constant 0 : i32
    %c0_i32_0 = arith.constant 0 : i32
    %c0_i32_1 = arith.constant 0 : i32
    return %arg0, %c0_i32, %c0_i32_0 : i32, i32, i32
  }
}

</mosaic_0001>

<bundles_post_ra>
// kernel: tpu_custom_call.1
= control target key start
LH: loop header
LB: loop body
LE: loop exit
PB: predicated region body
PF: predicated region fallthrough
CT: control target
= control target key end

     0   :  { %9 = vsyncpa [#allocation3], 0  ;;  %s325_s0 = inlined_call_operand.hbm [shape: f32[8,16], index: 0, kind: input, shape index: {}]   ;;  %s326_s1 = inlined_call_operand.hbm [shape: f32[8,16], index: 1, kind: input, shape index: {}]   ;;  %s327_s2 = inlined_call_operand.hbm [shape: f32[8,16], index: 2, kind: input, shape index: {}]   ;;  %s328_s3 = inlined_call_operand.hbm [shape: f32[8,16], index: 3, kind: input, shape index: {}]   ;;  %s329_s4 = inlined_call_operand.hbm [shape: f32[1,8,128], index: 4, kind: output, shape index: {}]  }
   0x1   :  { %10 = vsyncpa [#allocation6], 0 }
   0x2   :  { %11 = vsyncpa [#allocation9], 0  ;;  %s29_s17 = sshll.u32 %s326_s1, 4  ;;  %s30_s17 = int_to_ptr.hbm [resolvable:$true] %s29_s17 }
   0x3   :  { %12 = vsyncpa [#allocation4], 0  ;;  %s280_s18 = smov [#allocation5]   ;;  %s18_s22 = sshll.u32 %s325_s0, 4  ;;  %s19_s22 = int_to_ptr.hbm [resolvable:$true] %s18_s22 }
   0x4   :  { %s31_s19 = sshll.u32 %s280_s18, 4  ;;  %s281_s23 = smov [#allocation2]   ;;  %s32_s19 = int_to_ptr.vmem [resolvable:$true] %s31_s19 }
   0x5   :  { %34 = dma.hbm_to_vmem [thread:$0]  %s30_s17, 128, %s32_s19, [#allocation6]  }
   0x6   :  { %s20_s24 = sshll.u32 %s281_s23, 4  ;;  %s40_s27 = sshll.u32 %s327_s2, 4  ;;  %s21_s24 = int_to_ptr.vmem [resolvable:$true] %s20_s24  ;;  %s41_s27 = int_to_ptr.hbm [resolvable:$true] %s40_s27 }
   0x7   :  { %23 = dma.hbm_to_vmem [thread:$0]  %s19_s22, 128, %s21_s24, [#allocation3]  }
   0x8   :  { %s51_s29 = sshll.u32 %s328_s3, 4  ;;  %s282_s30 = smov [#allocation7]   ;;  %s52_s29 = int_to_ptr.hbm [resolvable:$true] %s51_s29 }
   0x9   :  { %s42_s5 = sshll.u32 %s282_s30, 4  ;;  %s283_s0 = smov [#allocation8]   ;;  %s43_s5 = int_to_ptr.vmem [resolvable:$true] %s42_s5 }
   0xa   :  { %45 = dma.hbm_to_vmem [thread:$0]  %s41_s27, 128, %s43_s5, [#allocation6]  }
   0xb   :  { %s53_s6 = sshll.u32 %s283_s0, 4  ;;  %s54_s6 = int_to_ptr.vmem [resolvable:$true] %s53_s6 }
   0xc   :  { %56 = dma.hbm_to_vmem [thread:$0]  %s52_s29, 128, %s54_s6, [#allocation9]  }
   0xd   :  { %272 = dma.done.wait [#allocation3], 128  }
   0xe   :  { %273 = vsyncadd [#allocation3], 4294967168 }
   0xf   :  { %274 = dma.done.wait [#allocation6], 256  }
  0x10   :  { %275 = vsyncadd [#allocation6], 4294967040 }
  0x11   :  { %276 = dma.done.wait [#allocation9], 128  }
  0x12   :  { %277 = vsyncadd [#allocation9], 4294967168  ;;  %v73_v0 = vld [vmem:[#allocation2] sm:$0xff]  ;;  %v74_v1 = vld [vmem:[#allocation5] sm:$0xff]  ;;  %vm76_vm0 = vcmask 130048   ;;  %vm106_vm1 = vcmask 7168  }
  0x13   :  { %v75_v2 = vadd.f32 %v74_v1, %v73_v0  ;;  %v88_v7 = vld [vmem:[#allocation8] sm:$0xff]  ;;  %v83_v8 = vld [vmem:[#allocation7] sm:$0xff]  ;;  %s284_s2 = smov [#allocation10]   ;;  %s127_s9 = sshll.u32 %s329_s4, 4  ;;  %s128_s9 = int_to_ptr.hbm [resolvable:$true] %s127_s9 }
  0x14   :  { %s125_s3 = sshll.u32 %s284_s2, 4  ;;  %s126_s3 = int_to_ptr.vmem [resolvable:$true] %s125_s3 }
  0x15   :  { %v77_v3 = vsel %vm76_vm0, %v75_v2, -inf }
  0x16   :  { %78 = vmax.xlane.f32.xlu0 %v77_v3 }
  0x89   :  { %v79_v4 = vpop.xlane.xlu0 %78 }
  0x8a   :  { %v80_v5 = vsub.f32 %v75_v2, %v79_v4 }
  0x8c   :  { %v81_v6 = vmul.f32 1.442695, %v80_v5 }
  0x8e   :  { %146 = vpow2.f32 %v81_v6 }
  0x94   :  { %v147_v9 = vpop.eup %146 }
  0x95   :  { %v89_v10 = vmul.f32 %v147_v9, %v88_v7  ;;  %v84_v11 = vmul.f32 %v147_v9, %v83_v8 }
  0x97   :  { %v90_v12 = vsel %vm76_vm0, %v89_v10, 0.0  ;;  %v85_v13 = vsel %vm76_vm0, %v84_v11, 0.0 }
  0x98   :  { %91 = vadd.xlane.f32.xlu1 %v90_v12  ;;  %86 = vadd.xlane.f32.xlu0 %v85_v13 }
 0x10b   :  { %v92_v14 = vpop.xlane.xlu1 %91  ;;  %v87_v15 = vpop.xlane.xlu0 %86 }
 0x10c   :  { %v93_v16 = vadd.f32 %v92_v14, %v87_v15  ;;  %148 = vlog2.f32 %v87_v15 }
 0x10e   :  { %150 = vlog2.f32 %v93_v16 }
 0x112   :  { %v149_v17 = vpop.eup %148 }
 0x113   :  { %v97_v20 = vmul.f32 0.6931472, %v149_v17 }
 0x114   :  { %v151_v18 = vpop.eup %150 }
 0x115   :  { %v95_v19 = vmul.f32 0.6931472, %v151_v18 }
 0x117   :  { %v98_v21 = vsub.f32 %v95_v19, %v97_v20 }
 0x119   :  { %v107_v22 = vsel %vm106_vm1, %v98_v21, 0.0 }
 0x11a   :  { %108 = vadd.xlane.f32.xlu1 %v107_v22 }
 0x18d   :  { %v109_v23 = vpop.xlane.xlu1 %108 }
 0x18e   :  { %v110_v24 = vrot.slane %v109_v23, 4 }
 0x190   :  { %v111_v25 = vadd.f32 %v110_v24, %v109_v23 }
 0x192   :  { %v112_v26 = vrot.slane %v111_v25, 2 }
 0x194   :  { %v113_v27 = vadd.f32 %v112_v26, %v111_v25 }
 0x196   :  { %v114_v28 = vrot.slane %v113_v27, 1 }
 0x198   :  { %v115_v29 = vadd.f32 %v114_v28, %v113_v27 }
 0x19a   :  { %139 = vpush %v115_v29 }
 0x1cb   :  { %s140_s10 = spop %139 }
 0x1cc   :  { %v117_v30 = vstv %s140_s10 }
 0x1cd   :  { %119 = vst [vmem:[#allocation10] sm:$0xff] %v117_v30 }
 0x1ce   :  { %130 = dma.vmem_to_hbm [thread:$0]  %s126_s3, 128, %s128_s9, [#allocation4]  }
 0x1cf   :  { %278 = dma.done.wait [#allocation4], 128  }
 0x1d0   :  { %279 = vsyncadd [#allocation4], 4294967168 }
 0x1d1   :  { %135 = vsyncpa [#allocation3], 1 }
 0x1d2   :  { %136 = vsyncpa [#allocation6], 1 }
 0x1d3   :  { %137 = vsyncpa [#allocation9], 1 }
 0x1d4   :  { %138 = vsyncpa [#allocation4], 1 }

// kernel: tpu_custom_call.1
= control target key start
LH: loop header
LB: loop body
LE: loop exit
PB: predicated region body
PF: predicated region fallthrough
CT: control target
= control target key end

     0   :  { %9 = vsyncpa [#allocation3], 0  ;;  %s325_s0 = inlined_call_operand.hbm [shape: f32[8,16], index: 0, kind: input, shape index: {}]   ;;  %s326_s1 = inlined_call_operand.hbm [shape: f32[8,16], index: 1, kind: input, shape index: {}]   ;;  %s327_s2 = inlined_call_operand.hbm [shape: f32[8,16], index: 2, kind: input, shape index: {}]   ;;  %s328_s3 = inlined_call_operand.hbm [shape: f32[8,16], index: 3, kind: input, shape index: {}]   ;;  %s329_s4 = inlined_call_operand.hbm [shape: f32[1,8,128], index: 4, kind: output, shape index: {}]  }
   0x1   :  { %10 = vsyncpa [#allocation6], 0 }
   0x2   :  { %11 = vsyncpa [#allocation9], 0  ;;  %s29_s17 = sshll.u32 %s326_s1, 4  ;;  %s30_s17 = int_to_ptr.hbm [resolvable:$true] %s29_s17 }
   0x3   :  { %12 = vsyncpa [#allocation4], 0  ;;  %s280_s18 = smov [#allocation5]   ;;  %s18_s22 = sshll.u32 %s325_s0, 4  ;;  %s19_s22 = int_to_ptr.hbm [resolvable:$true] %s18_s22 }
   0x4   :  { %s31_s19 = sshll.u32 %s280_s18, 4  ;;  %s281_s23 = smov [#allocation2]   ;;  %s32_s19 = int_to_ptr.vmem [resolvable:$true] %s31_s19 }
   0x5   :  { %34 = dma.hbm_to_vmem [thread:$0]  %s30_s17, 128, %s32_s19, [#allocation6]  }
   0x6   :  { %s20_s24 = sshll.u32 %s281_s23, 4  ;;  %s40_s27 = sshll.u32 %s327_s2, 4  ;;  %s21_s24 = int_to_ptr.vmem [resolvable:$true] %s20_s24  ;;  %s41_s27 = int_to_ptr.hbm [resolvable:$true] %s40_s27 }
   0x7   :  { %23 = dma.hbm_to_vmem [thread:$0]  %s19_s22, 128, %s21_s24, [#allocation3]  }
   0x8   :  { %s51_s29 = sshll.u32 %s328_s3, 4  ;;  %s282_s30 = smov [#allocation7]   ;;  %s52_s29 = int_to_ptr.hbm [resolvable:$true] %s51_s29 }
   0x9   :  { %s42_s5 = sshll.u32 %s282_s30, 4  ;;  %s283_s0 = smov [#allocation8]   ;;  %s43_s5 = int_to_ptr.vmem [resolvable:$true] %s42_s5 }
   0xa   :  { %45 = dma.hbm_to_vmem [thread:$0]  %s41_s27, 128, %s43_s5, [#allocation6]  }
   0xb   :  { %s53_s6 = sshll.u32 %s283_s0, 4  ;;  %s54_s6 = int_to_ptr.vmem [resolvable:$true] %s53_s6 }
   0xc   :  { %56 = dma.hbm_to_vmem [thread:$0]  %s52_s29, 128, %s54_s6, [#allocation9]  }
   0xd   :  { %272 = dma.done.wait [#allocation3], 128  }
   0xe   :  { %273 = vsyncadd [#allocation3], 4294967168 }
   0xf   :  { %274 = dma.done.wait [#allocation6], 256  }
  0x10   :  { %275 = vsyncadd [#allocation6], 4294967040 }
  0x11   :  { %276 = dma.done.wait [#allocation9], 128  }
  0x12   :  { %277 = vsyncadd [#allocation9], 4294967168  ;;  %v73_v0 = vld [vmem:[#allocation2] sm:$0xff]  ;;  %v74_v1 = vld [vmem:[#allocation5] sm:$0xff]  ;;  %vm76_vm0 = vcmask 130048   ;;  %vm106_vm1 = vcmask 7168  }
  0x13   :  { %v75_v2 = vadd.f32 %v74_v1, %v73_v0  ;;  %v88_v7 = vld [vmem:[#allocation8] sm:$0xff]  ;;  %v83_v8 = vld [vmem:[#allocation7] sm:$0xff]  ;;  %s284_s2 = smov [#allocation10]   ;;  %s127_s9 = sshll.u32 %s329_s4, 4  ;;  %s128_s9 = int_to_ptr.hbm [resolvable:$true] %s127_s9 }
  0x14   :  { %s125_s3 = sshll.u32 %s284_s2, 4  ;;  %s126_s3 = int_to_ptr.vmem [resolvable:$true] %s125_s3 }
  0x15   :  { %v77_v3 = vsel %vm76_vm0, %v75_v2, -inf }
  0x16   :  { %78 = vmax.xlane.f32.xlu0 %v77_v3 }
  0x89   :  { %v79_v4 = vpop.xlane.xlu0 %78 }
  0x8a   :  { %v80_v5 = vsub.f32 %v75_v2, %v79_v4 }
  0x8c   :  { %v81_v6 = vmul.f32 1.442695, %v80_v5 }
  0x8e   :  { %146 = vpow2.f32 %v81_v6 }
  0x94   :  { %v147_v9 = vpop.eup %146 }
  0x95   :  { %v89_v10 = vmul.f32 %v147_v9, %v88_v7  ;;  %v84_v11 = vmul.f32 %v147_v9, %v83_v8 }
  0x97   :  { %v90_v12 = vsel %vm76_vm0, %v89_v10, 0.0  ;;  %v85_v13 = vsel %vm76_vm0, %v84_v11, 0.0 }
  0x98   :  { %91 = vadd.xlane.f32.xlu1 %v90_v12  ;;  %86 = vadd.xlane.f32.xlu0 %v85_v13 }
 0x10b   :  { %v92_v14 = vpop.xlane.xlu1 %91  ;;  %v87_v15 = vpop.xlane.xlu0 %86 }
 0x10c   :  { %v93_v16 = vadd.f32 %v92_v14, %v87_v15  ;;  %148 = vlog2.f32 %v87_v15 }
 0x10e   :  { %150 = vlog2.f32 %v93_v16 }
 0x112   :  { %v149_v17 = vpop.eup %148 }
 0x113   :  { %v97_v20 = vmul.f32 0.6931472, %v149_v17 }
 0x114   :  { %v151_v18 = vpop.eup %150 }
 0x115   :  { %v95_v19 = vmul.f32 0.6931472, %v151_v18 }
 0x117   :  { %v98_v21 = vsub.f32 %v95_v19, %v97_v20 }
 0x119   :  { %v107_v22 = vsel %vm106_vm1, %v98_v21, 0.0 }
 0x11a   :  { %108 = vadd.xlane.f32.xlu1 %v107_v22 }
 0x18d   :  { %v109_v23 = vpop.xlane.xlu1 %108 }
 0x18e   :  { %v110_v24 = vrot.slane %v109_v23, 4 }
 0x190   :  { %v111_v25 = vadd.f32 %v110_v24, %v109_v23 }
 0x192   :  { %v112_v26 = vrot.slane %v111_v25, 2 }
 0x194   :  { %v113_v27 = vadd.f32 %v112_v26, %v111_v25 }
 0x196   :  { %v114_v28 = vrot.slane %v113_v27, 1 }
 0x198   :  { %v115_v29 = vadd.f32 %v114_v28, %v113_v27 }
 0x19a   :  { %139 = vpush %v115_v29 }
 0x1cb   :  { %s140_s10 = spop %139 }
 0x1cc   :  { %v117_v30 = vstv %s140_s10 }
 0x1cd   :  { %119 = vst [vmem:[#allocation10] sm:$0xff] %v117_v30 }
 0x1ce   :  { %130 = dma.vmem_to_hbm [thread:$0]  %s126_s3, 128, %s128_s9, [#allocation4]  }
 0x1cf   :  { %278 = dma.done.wait [#allocation4], 128  }
 0x1d0   :  { %279 = vsyncadd [#allocation4], 4294967168 }
 0x1d1   :  { %135 = vsyncpa [#allocation3], 1 }
 0x1d2   :  { %136 = vsyncpa [#allocation6], 1 }
 0x1d3   :  { %137 = vsyncpa [#allocation9], 1 }
 0x1d4   :  { %138 = vsyncpa [#allocation4], 1 }

</bundles_post_ra>
